<compile_context>
chip_gen: v6e
topology: v6e:2x2x1
jax: 0.10.0
libtpu: 0.0.40
codegen_flags: <defaults>
</compile_context>

<pallas_src>
import functools

import jax
import jax.numpy as jnp
from jax.experimental import pallas as pl
from jax.experimental.pallas import tpu as pltpu


# ------------------------------ helpers ------------------------------------

def _pad_to(v, m):
    return ((v + m - 1) // m) * m


def _pick_row_tile(n, prefer=512, min_tiles=2):
    """Largest tile in {512,256,128} (<= prefer) dividing n, preferring >= min_tiles tiles."""
    cands = [t for t in (512, 256, 128) if t <= prefer]
    for t in cands:
        if n % t == 0 and n // t >= min_tiles:
            return t
    for t in cands:
        if n % t == 0:
            return t
    return n


def _vmem_limit_bytes():
    """Generation-aware VMEM budget: ~3/4 of capacity, capped; safe fallback 48 MiB."""
    cap = 64 << 20
    try:
        info = pltpu.get_tpu_info()
        cap = int(getattr(info, "vmem_capacity_bytes", cap)) or cap
    except Exception:
        pass
    return int(min((cap * 3) // 4, 96 << 20))


# --------------------------- Pallas kernels --------------------------------

def linear_kernel(x_ref, w_ref, b_ref, o_ref):
    # y = x @ W + b   (x, W in bf16 -> native MXU path; f32 accumulation; b f32)
    o_ref[...] = (
        jnp.dot(x_ref[...], w_ref[...], preferred_element_type=jnp.float32)
        + b_ref[...]
    )


def linear(x_bf16, w_t_bf16, b_f32, *, vmem_limit):
    N, Din = x_bf16.shape
    Dout = w_t_bf16.shape[1]
    tm = _pick_row_tile(N, prefer=512, min_tiles=2)
    return pl.pallas_call(
        linear_kernel,
        out_shape=jax.ShapeDtypeStruct((N, Dout), jnp.float32),
        grid=(N // tm,),
        in_specs=[
            pl.BlockSpec((tm, Din), lambda i: (i, 0)),
            pl.BlockSpec((Din, Dout), lambda i: (0, 0)),   # resident weights (bf16)
            pl.BlockSpec((1, Dout), lambda i: (0, 0)),     # resident bias (f32)
        ],
        out_specs=pl.BlockSpec((tm, Dout), lambda i: (i, 0)),
        compiler_params=pltpu.CompilerParams(
            dimension_semantics=("parallel",),
            vmem_limit_bytes=vmem_limit,
        ),
    )(x_bf16, w_t_bf16, b_f32.reshape(1, Dout))


def sage_layer_kernel(a_ref, xs_ref, xd_ref, dinv_ref, wn_ref, ws_ref, bs_ref, o_ref):
    """Edge-weight-normalized SAGE layer on pre-masked (MaxK) bf16 activations.

    Reduction over src tiles (axis 1), accumulating f32 directly into the
    resident output block:
        acc[i] = sum_k A01[i, k] @ x_sparse[k]          (bf16 MXU, f32 acc)
    Finalize (last src tile):
        out[i] = bf16(acc[i] * 1/in_deg[i]) @ Wn + x_sparse[i] @ Ws + b
    """
    kk = pl.program_id(1)

    @pl.when(kk == 0)
    def _():
        o_ref[...] = jnp.zeros_like(o_ref)

    o_ref[...] += jnp.dot(a_ref[...], xs_ref[...],
                          preferred_element_type=jnp.float32)

    @pl.when(kk == pl.num_programs(1) - 1)
    def _():
        # per-dst-row 1/in_deg scale in f32 (exact mean), then bf16 MXU finalize.
        agg = (o_ref[...] * dinv_ref[...]).astype(jnp.bfloat16)
        h = jnp.dot(agg, wn_ref[...], preferred_element_type=jnp.float32)
        h = h + jnp.dot(xd_ref[...], ws_ref[...], preferred_element_type=jnp.float32)
        o_ref[...] = h + bs_ref[...]


def sage_layer(x_sparse_bf16, a_bin, deg_inv, wn_t_bf16, ws_t_bf16, bias_f32, *, vmem_limit):
    N, H = x_sparse_bf16.shape
    tm = _pick_row_tile(N, prefer=512, min_tiles=2)   # >=2 dst tiles -> v7x megacore balance
    tk = _pick_row_tile(N, prefer=512, min_tiles=1)
    grid = (N // tm, N // tk)                         # reduction (src) axis last
    # TODO(synk): for sparse graphs, skip all-zero (dst,src) A tiles via a
    # prefetched block-nonzero map (PrefetchScalarGridSpec) to cut N^2 A traffic.
    return pl.pallas_call(
        sage_layer_kernel,
        out_shape=jax.ShapeDtypeStruct((N, H), jnp.float32),
        grid=grid,
        in_specs=[
            pl.BlockSpec((tm, tk), lambda i, k: (i, k)),   # A (0/1 bf16) [dst, src]
            pl.BlockSpec((tk, H), lambda i, k: (k, 0)),    # x_sparse bf16 (src rows)
            pl.BlockSpec((tm, H), lambda i, k: (i, 0)),    # x_sparse bf16 (dst rows)
            pl.BlockSpec((tm, 1), lambda i, k: (i, 0)),    # 1/in_deg f32 (dst rows)
            pl.BlockSpec((H, H), lambda i, k: (0, 0)),     # Wn^T bf16, resident
            pl.BlockSpec((H, H), lambda i, k: (0, 0)),     # Ws^T bf16, resident
            pl.BlockSpec((1, H), lambda i, k: (0, 0)),     # bias f32, resident
        ],
        out_specs=pl.BlockSpec((tm, H), lambda i, k: (i, 0)),
        compiler_params=pltpu.CompilerParams(
            dimension_semantics=("parallel", "arbitrary"),
            vmem_limit_bytes=vmem_limit,
        ),
    )(a_bin, x_sparse_bf16, x_sparse_bf16, deg_inv, wn_t_bf16, ws_t_bf16,
      bias_f32.reshape(1, H))


# ------------------------------- glue (JAX) ---------------------------------

def xavier_uniform(key, shape, gain=1.0):
    fan_out, fan_in = shape  # torch.nn.Linear weight layout: (out_features, in_features)
    bound = gain * (6.0 / (fan_in + fan_out)) ** 0.5
    return jax.random.uniform(key, shape, jnp.float32, -bound, bound)


def uniform_bias(key, out_features, in_features):
    bound = 1.0 / (in_features ** 0.5)
    return jax.random.uniform(key, (out_features,), jnp.float32, -bound, bound)


def init_params(key, in_size, hid_size, out_size, num_layers):
    relu_gain = 2.0 ** 0.5  # nn.init.calculate_gain('relu')
    keys = jax.random.split(key, 4 + 3 * num_layers)
    params = {
        "lin_in_w": xavier_uniform(keys[0], (hid_size, in_size), gain=1.0),
        "lin_in_b": uniform_bias(keys[1], hid_size, in_size),
        "lin_out_w": xavier_uniform(keys[2], (out_size, hid_size), gain=1.0),
        "lin_out_b": uniform_bias(keys[3], out_size, hid_size),
        "layers": [],
    }
    for i in range(num_layers):
        k0, k1, k2 = keys[4 + 3 * i: 7 + 3 * i]
        params["layers"].append(
            {
                "w_neigh": xavier_uniform(k0, (hid_size, hid_size), gain=relu_gain),
                "w_self": xavier_uniform(k1, (hid_size, hid_size), gain=relu_gain),
                "b_self": uniform_bias(k2, hid_size, hid_size),
            }
        )
    return params


def build_graph(key, num_nodes, edge_prob=0.15):
    """Dense stand-in for the CSR SpGEMM with pre-normalized edge weights.
    Returns the 0/1 adjacency [dst, src] in bf16 (exact) plus 1/in_deg(dst) in f32.
    TODO(synk): the original uses a custom CSR/CSC SpGEMM wrapper with warp
    metadata; here the same math is a dense bf16 matmul + per-row f32 scale."""
    adj_sd = jax.random.bernoulli(key, edge_prob, (num_nodes, num_nodes))  # [src, dst]
    a_ds = adj_sd.T.astype(jnp.float32)                                    # [dst, src]
    in_deg = jnp.clip(jnp.sum(a_ds, axis=1), 1.0, None)                    # clamp(min=1)
    deg_inv = (1.0 / in_deg)[:, None].astype(jnp.float32)                  # [N, 1]
    return a_ds.astype(jnp.bfloat16), deg_inv


def maxk_sparse_bf16(x_f32, k):
    """Per-row MaxK: mask decided in f32 (k-th largest as threshold), streamed as bf16.
    TODO(synk): torch.topk+scatter keeps exactly k entries; the threshold form
    keeps >k entries on exact ties at the k-th value (measure-zero for floats)."""
    thr = jax.lax.top_k(x_f32, k)[0][:, k - 1:k]
    return jnp.where(x_f32 >= thr, x_f32, 0.0).astype(jnp.bfloat16)


def model_forward(params, a_bin, deg_inv, x, k, out_size, vmem_limit):
    # feat_drop is identity in eval mode, so it is omitted.
    N, in_size = x.shape
    hid = params["lin_in_w"].shape[0]
    assert hid % 128 == 0, "hid_size must be lane-dense (multiple of 128)"

    # Lane-dense padding: feature dims -> multiples of 128; node dim -> multiple
    # of 256 so a 128-wide dst tile always yields >= 2 tiles (v7x megacore).
    n_p = _pad_to(max(N, 256), 256)
    in_p = _pad_to(in_size, 128)
    out_p = _pad_to(out_size, 128)

    x = jnp.pad(x, ((0, n_p - N), (0, in_p - in_size)))
    a_bin = jnp.pad(a_bin, ((0, n_p - N), (0, n_p - N)))
    deg_inv = jnp.pad(deg_inv, ((0, n_p - N), (0, 0)), constant_values=1.0)

    # Pre-cast weights to bf16 once (native MXU path; f32 accumulation in-kernel).
    w_in = jnp.pad(params["lin_in_w"].T,
                   ((0, in_p - in_size), (0, 0))).astype(jnp.bfloat16)      # [in_p, hid]
    w_out = jnp.pad(params["lin_out_w"].T,
                    ((0, 0), (0, out_p - out_size))).astype(jnp.bfloat16)   # [hid, out_p]
    b_out = jnp.pad(params["lin_out_b"], (0, out_p - out_size))

    x = linear(x.astype(jnp.bfloat16), w_in, params["lin_in_b"], vmem_limit=vmem_limit)
    # NOTE: padded rows of x now equal the lin_in bias (not zero). Harmless:
    # A's padded src columns are zero and padded dst rows are sliced off below.
    for lp in params["layers"]:
        x_sparse = maxk_sparse_bf16(x, k)
        x = sage_layer(
            x_sparse, a_bin, deg_inv,
            lp["w_neigh"].T.astype(jnp.bfloat16),
            lp["w_self"].T.astype(jnp.bfloat16),
            lp["b_self"],
            vmem_limit=vmem_limit,
        )
    x = linear(x.astype(jnp.bfloat16), w_out, b_out, vmem_limit=vmem_limit)
    return x[:N, :out_size]


# --------------------------------- main -------------------------------------

if __name__ == "__main__":
    NUM_NODES = 256
    IN_SIZE = 64
    HID_SIZE = 128
    OUT_SIZE = 16
    NUM_HID_LAYERS = 2
    MAXK = 16

    root = jax.random.PRNGKey(0)
    k_params, k_graph, k_feat = jax.random.split(root, 3)

    params = init_params(k_params, IN_SIZE, HID_SIZE, OUT_SIZE, NUM_HID_LAYERS)
    a_bin, deg_inv = build_graph(k_graph, NUM_NODES)
    x = jax.random.normal(k_feat, (NUM_NODES, IN_SIZE), jnp.float32)

    vmem_limit = _vmem_limit_bytes()
    fwd = jax.jit(functools.partial(model_forward, k=MAXK, out_size=OUT_SIZE,
                                    vmem_limit=vmem_limit))
    out = fwd(params, a_bin, deg_inv, x)
    out = jax.block_until_ready(out)

    assert out.shape == (NUM_NODES, OUT_SIZE), out.shape
    assert bool(jnp.all(jnp.isfinite(out)))
    print("KERNEL_OK")
</pallas_src>

<mosaic_0001>
module attributes {stable_mosaic.version = 11 : i64} {
  func.func @linear_kernel(%arg0: i32, %arg1: memref<128x128xbf16, #tpu.memory_space<vmem>>, %arg2: memref<128x128xbf16, #tpu.memory_space<vmem>>, %arg3: memref<1x128xf32, #tpu.memory_space<vmem>>, %arg4: memref<128x128xf32, #tpu.memory_space<vmem>>) attributes {dimension_semantics = [#tpu.dimension_semantics<parallel>], iteration_bounds = array<i64: 2>, scalar_prefetch = 0 : i64, scratch_operands = 0 : i64, tpu.core_type = #tpu.core_type<tc>, window_params = [{transform_indices = @transform_0, window_bounds = array<i64: 128, 128>}, {pipeline_mode = #tpu.pipeline_mode<synchronous>, transform_indices = @transform_1, window_bounds = array<i64: 128, 128>}, {pipeline_mode = #tpu.pipeline_mode<synchronous>, transform_indices = @transform_2, window_bounds = array<i64: 1, 128>}, {transform_indices = @transform_3, window_bounds = array<i64: 128, 128>}]} {
    %c0 = arith.constant 0 : index
    %c0_0 = arith.constant 0 : index
    %0 = vector.load %arg1[%c0, %c0_0] : memref<128x128xbf16, #tpu.memory_space<vmem>>, vector<128x128xbf16>
    %c0_1 = arith.constant 0 : index
    %c0_2 = arith.constant 0 : index
    %1 = vector.load %arg2[%c0_1, %c0_2] : memref<128x128xbf16, #tpu.memory_space<vmem>>, vector<128x128xbf16>
    %cst = arith.constant dense<0.000000e+00> : vector<128x128xf32>
    %2 = tpu.matmul %0, %1, %cst {dimension_numbers = #tpu.dot_dimension_numbers<[1], [0], [0], [1], [0, 0, 1, 1], [], []>} : vector<128x128xbf16>, vector<128x128xbf16>, vector<128x128xf32> -> vector<128x128xf32>
    %c0_3 = arith.constant 0 : index
    %c0_4 = arith.constant 0 : index
    %3 = vector.load %arg3[%c0_3, %c0_4] : memref<1x128xf32, #tpu.memory_space<vmem>>, vector<1x128xf32>
    %4 = vector.broadcast %3 : vector<1x128xf32> to vector<128x128xf32>
    %5 = arith.addf %2, %4 : vector<128x128xf32>
    %c0_5 = arith.constant 0 : index
    %c0_6 = arith.constant 0 : index
    %6 = vector.load %arg4[%c0_5, %c0_6] : memref<128x128xf32, #tpu.memory_space<vmem>>, vector<128x128xf32>
    tpu.vector_store %arg4[%c0_5, %c0_6], %5 {strides = array<i32>} : memref<128x128xf32, #tpu.memory_space<vmem>>, vector<128x128xf32>,
    return
  }
  func.func @transform_0(%arg0: i32) -> (i32, i32) {
    %c0_i32 = arith.constant 0 : i32
    %c0_i32_0 = arith.constant 0 : i32
    return %arg0, %c0_i32 : i32, i32
  }
  func.func @transform_1(%arg0: i32) -> (i32, i32) {
    %c0_i32 = arith.constant 0 : i32
    %c0_i32_0 = arith.constant 0 : i32
    %c0_i32_1 = arith.constant 0 : i32
    return %c0_i32, %c0_i32_0 : i32, i32
  }
  func.func @transform_2(%arg0: i32) -> (i32, i32) {
    %c0_i32 = arith.constant 0 : i32
    %c0_i32_0 = arith.constant 0 : i32
    %c0_i32_1 = arith.constant 0 : i32
    return %c0_i32, %c0_i32_0 : i32, i32
  }
  func.func @transform_3(%arg0: i32) -> (i32, i32) {
    %c0_i32 = arith.constant 0 : i32
    %c0_i32_0 = arith.constant 0 : i32
    return %arg0, %c0_i32 : i32, i32
  }
}

module attributes {stable_mosaic.version = 11 : i64} {
  func.func @sage_layer_kernel(%arg0: i32, %arg1: i32, %arg2: memref<128x256xbf16, #tpu.memory_space<vmem>>, %arg3: memref<256x128xbf16, #tpu.memory_space<vmem>>, %arg4: memref<128x128xbf16, #tpu.memory_space<vmem>>, %arg5: memref<128x1xf32, #tpu.memory_space<vmem>>, %arg6: memref<128x128xbf16, #tpu.memory_space<vmem>>, %arg7: memref<128x128xbf16, #tpu.memory_space<vmem>>, %arg8: memref<1x128xf32, #tpu.memory_space<vmem>>, %arg9: memref<128x128xf32, #tpu.memory_space<vmem>>) attributes {dimension_semantics = [#tpu.dimension_semantics<parallel>, #tpu.dimension_semantics<arbitrary>], iteration_bounds = array<i64: 2, 1>, scalar_prefetch = 0 : i64, scratch_operands = 0 : i64, tpu.core_type = #tpu.core_type<tc>, window_params = [{transform_indices = @transform_0, window_bounds = array<i64: 128, 256>}, {transform_indices = @transform_1, window_bounds = array<i64: 256, 128>}, {transform_indices = @transform_2, window_bounds = array<i64: 128, 128>}, {transform_indices = @transform_3, window_bounds = array<i64: 128, 1>}, {pipeline_mode = #tpu.pipeline_mode<synchronous>, transform_indices = @transform_4, window_bounds = array<i64: 128, 128>}, {pipeline_mode = #tpu.pipeline_mode<synchronous>, transform_indices = @transform_5, window_bounds = array<i64: 128, 128>}, {pipeline_mode = #tpu.pipeline_mode<synchronous>, transform_indices = @transform_6, window_bounds = array<i64: 1, 128>}, {transform_indices = @transform_7, window_bounds = array<i64: 128, 128>}]} {
    %c0_i32 = arith.constant 0 : i32
    %0 = arith.cmpi eq, %arg1, %c0_i32 : i32
    %1 = arith.extui %0 : i1 to i32
    %c0_i32_0 = arith.constant 0 : i32
    %2 = arith.cmpi ne, %1, %c0_i32_0 : i32
    scf.if %2 {
      %cst_10 = arith.constant 0.000000e+00 : f32
      %12 = vector.broadcast %cst_10 : f32 to vector<128x128xf32>
      %c0_11 = arith.constant 0 : index
      %c0_12 = arith.constant 0 : index
      %13 = vector.load %arg9[%c0_11, %c0_12] : memref<128x128xf32, #tpu.memory_space<vmem>>, vector<128x128xf32>
      tpu.vector_store %arg9[%c0_11, %c0_12], %12 {strides = array<i32>} : memref<128x128xf32, #tpu.memory_space<vmem>>, vector<128x128xf32>,
    } else {
    }
    %c0 = arith.constant 0 : index
    %c0_1 = arith.constant 0 : index
    %3 = vector.load %arg9[%c0, %c0_1] : memref<128x128xf32, #tpu.memory_space<vmem>>, vector<128x128xf32>
    %c0_2 = arith.constant 0 : index
    %c0_3 = arith.constant 0 : index
    %4 = vector.load %arg2[%c0_2, %c0_3] : memref<128x256xbf16, #tpu.memory_space<vmem>>, vector<128x256xbf16>
    %c0_4 = arith.constant 0 : index
    %c0_5 = arith.constant 0 : index
    %5 = vector.load %arg3[%c0_4, %c0_5] : memref<256x128xbf16, #tpu.memory_space<vmem>>, vector<256x128xbf16>
    %cst = arith.constant dense<0.000000e+00> : vector<128x128xf32>
    %6 = tpu.matmul %4, %5, %cst {dimension_numbers = #tpu.dot_dimension_numbers<[1], [0], [0], [1], [0, 0, 1, 1], [], []>} : vector<128x256xbf16>, vector<256x128xbf16>, vector<128x128xf32> -> vector<128x128xf32>
    %7 = arith.addf %3, %6 : vector<128x128xf32>
    %c0_6 = arith.constant 0 : index
    %c0_7 = arith.constant 0 : index
    %8 = vector.load %arg9[%c0_6, %c0_7] : memref<128x128xf32, #tpu.memory_space<vmem>>, vector<128x128xf32>
    tpu.vector_store %arg9[%c0_6, %c0_7], %7 {strides = array<i32>} : memref<128x128xf32, #tpu.memory_space<vmem>>, vector<128x128xf32>,
    %c0_i32_8 = arith.constant 0 : i32
    %9 = arith.cmpi eq, %arg1, %c0_i32_8 : i32
    %10 = arith.extui %9 : i1 to i32
    %c0_i32_9 = arith.constant 0 : i32
    %11 = arith.cmpi ne, %10, %c0_i32_9 : i32
    scf.if %11 {
      %c0_10 = arith.constant 0 : index
      %c0_11 = arith.constant 0 : index
      %12 = vector.load %arg9[%c0_10, %c0_11] : memref<128x128xf32, #tpu.memory_space<vmem>>, vector<128x128xf32>
      %c0_12 = arith.constant 0 : index
      %c0_13 = arith.constant 0 : index
      %13 = vector.load %arg5[%c0_12, %c0_13] : memref<128x1xf32, #tpu.memory_space<vmem>>, vector<128x1xf32>
      %14 = vector.broadcast %13 : vector<128x1xf32> to vector<128x128xf32>
      %15 = arith.mulf %12, %14 : vector<128x128xf32>
      %16 = arith.truncf %15 : vector<128x128xf32> to vector<128x128xbf16>
      %c0_14 = arith.constant 0 : index
      %c0_15 = arith.constant 0 : index
      %17 = vector.load %arg6[%c0_14, %c0_15] : memref<128x128xbf16, #tpu.memory_space<vmem>>, vector<128x128xbf16>
      %cst_16 = arith.constant dense<0.000000e+00> : vector<128x128xf32>
      %18 = tpu.matmul %16, %17, %cst_16 {dimension_numbers = #tpu.dot_dimension_numbers<[1], [0], [0], [1], [0, 0, 1, 1], [], []>} : vector<128x128xbf16>, vector<128x128xbf16>, vector<128x128xf32> -> vector<128x128xf32>
      %c0_17 = arith.constant 0 : index
      %c0_18 = arith.constant 0 : index
      %19 = vector.load %arg4[%c0_17, %c0_18] : memref<128x128xbf16, #tpu.memory_space<vmem>>, vector<128x128xbf16>
      %c0_19 = arith.constant 0 : index
      %c0_20 = arith.constant 0 : index
      %20 = vector.load %arg7[%c0_19, %c0_20] : memref<128x128xbf16, #tpu.memory_space<vmem>>, vector<128x128xbf16>
      %cst_21 = arith.constant dense<0.000000e+00> : vector<128x128xf32>
      %21 = tpu.matmul %19, %20, %cst_21 {dimension_numbers = #tpu.dot_dimension_numbers<[1], [0], [0], [1], [0, 0, 1, 1], [], []>} : vector<128x128xbf16>, vector<128x128xbf16>, vector<128x128xf32> -> vector<128x128xf32>
      %22 = arith.addf %18, %21 : vector<128x128xf32>
      %c0_22 = arith.constant 0 : index
      %c0_23 = arith.constant 0 : index
      %23 = vector.load %arg8[%c0_22, %c0_23] : memref<1x128xf32, #tpu.memory_space<vmem>>, vector<1x128xf32>
      %24 = vector.broadcast %23 : vector<1x128xf32> to vector<128x128xf32>
      %25 = arith.addf %22, %24 : vector<128x128xf32>
      %c0_24 = arith.constant 0 : index
      %c0_25 = arith.constant 0 : index
      %26 = vector.load %arg9[%c0_24, %c0_25] : memref<128x128xf32, #tpu.memory_space<vmem>>, vector<128x128xf32>
      tpu.vector_store %arg9[%c0_24, %c0_25], %25 {strides = array<i32>} : memref<128x128xf32, #tpu.memory_space<vmem>>, vector<128x128xf32>,
    } else {
    }
    return
  }
  func.func @transform_0(%arg0: i32, %arg1: i32) -> (i32, i32) {
    %c0_i32 = arith.constant 0 : i32
    return %arg0, %arg1 : i32, i32
  }
  func.func @transform_1(%arg0: i32, %arg1: i32) -> (i32, i32) {
    %c0_i32 = arith.constant 0 : i32
    %c0_i32_0 = arith.constant 0 : i32
    return %arg1, %c0_i32 : i32, i32
  }
  func.func @transform_2(%arg0: i32, %arg1: i32) -> (i32, i32) {
    %c0_i32 = arith.constant 0 : i32
    %c0_i32_0 = arith.constant 0 : i32
    return %arg0, %c0_i32 : i32, i32
  }
  func.func @transform_3(%arg0: i32, %arg1: i32) -> (i32, i32) {
    %c0_i32 = arith.constant 0 : i32
    %c0_i32_0 = arith.constant 0 : i32
    return %arg0, %c0_i32 : i32, i32
  }
  func.func @transform_4(%arg0: i32, %arg1: i32) -> (i32, i32) {
    %c0_i32 = arith.constant 0 : i32
    %c0_i32_0 = arith.constant 0 : i32
    %c0_i32_1 = arith.constant 0 : i32
    return %c0_i32, %c0_i32_0 : i32, i32
  }
  func.func @transform_5(%arg0: i32, %arg1: i32) -> (i32, i32) {
    %c0_i32 = arith.constant 0 : i32
    %c0_i32_0 = arith.constant 0 : i32
    %c0_i32_1 = arith.constant 0 : i32
    return %c0_i32, %c0_i32_0 : i32, i32
  }
  func.func @transform_6(%arg0: i32, %arg1: i32) -> (i32, i32) {
    %c0_i32 = arith.constant 0 : i32
    %c0_i32_0 = arith.constant 0 : i32
    %c0_i32_1 = arith.constant 0 : i32
    return %c0_i32, %c0_i32_0 : i32, i32
  }
  func.func @transform_7(%arg0: i32, %arg1: i32) -> (i32, i32) {
    %c0_i32 = arith.constant 0 : i32
    %c0_i32_0 = arith.constant 0 : i32
    return %arg0, %c0_i32 : i32, i32
  }
}

</mosaic_0001>

<bundles_post_ra>
// kernel: model_forward.4
= control target key start
LH: loop header
LB: loop body
LE: loop exit
PB: predicated region body
PF: predicated region fallthrough
CT: control target
= control target key end

     0   :  { %s623_s12 = smov 0   ;;  %s699_s0 = inlined_call_operand.vmem [shape: bf16[256,128], index: 0, kind: input, shape index: {}]   ;;  %s700_s1 = inlined_call_operand.vmem [shape: bf16[128,128], index: 1, kind: input, shape index: {}]   ;;  %s701_s2 = inlined_call_operand.vmem [shape: f32[1,128], index: 2, kind: input, shape index: {}]   ;;  %s702_s3 = inlined_call_operand.vmem [shape: f32[256,128], index: 3, kind: output, shape index: {}]  }
   0x1 LB: > { %s479_s13 = sadd.s32 4294967295, %s601_s12   ;;  %p483_p0 = scmp.ge.s32.totalorder %s601_s12, 1  ;;  %s601_s12 = sphi %s623_s12, %s13_s12  }
   0x2   : > { %p138_p1 = scmp.lt.s32.totalorder %s601_s12, 3 }
   0x4   : > { %p139_p2 = pnand %p483_p0, %p138_p1 }
   0x5   : > { %s484_s16 = sshll.u32 (!%p139_p2), %s479_s13, 4 }
   0x6   : > { %142 = sbr.rel (%p139_p2) target bundleno = 254 (0xfe), region = 32  ;;  %p163_p3 = scmp.lt.s32.totalorder (!%p139_p2), %s484_s16, 31 }
   0xb   : > { %v579_v0 = vld [vmem:[%s700_s1 + $0x38] sm:$0xff]   ;;  %v580_v1 = vld [vmem:[%s700_s1 + $0x30] sm:$0xff]   ;;  %s704_s16 = smov (!%p163_p3, %s484_s16), 31  ;;  %v581_v2 = vld [vmem:[%s700_s1 + $0x28] sm:$0xff]  }
   0xc   : > { %523 = vmatprep.subr.bf16.mxu0 %v579_v0  ;;  %555 = vmatprep.subr.bf16.mxu1 %v579_v0  ;;  %s485_s21 = sshll.u32 %s704_s16, 2  ;;  %v582_v3 = vld [vmem:[%s700_s1 + $0x20] sm:$0xff]   ;;  %v583_v6 = vld [vmem:[%s700_s1 + $0x18] sm:$0xff]   ;;  %v584_v7 = vld [vmem:[%s700_s1 + $0x10] sm:$0xff]   ;;  %s487_s8 = sshll.u32 %s704_s16, 3 }
   0xd   : > { %524 = vmatpush3.bf16.msra.mxu0 %v579_v0  ;;  %563 = vmatpush3.bf16.msra.mxu1 %v579_v0  ;;  %s646_s24 = scalar_lea.vmem %s699_s0, %s485_s21  ;;  %v585_v8 = vld [vmem:[%s700_s1 + $0x8] sm:$0xff]   ;;  %v586_v9 = vld [vmem:[%s700_s1] sm:$0xff]   ;;  %s678_s14 = scalar_lea.vmem %s702_s3, %s487_s8 }
   0xe   : > { %525 = vmatprep.subr.bf16.mxu0 %v580_v1  ;;  %556 = vmatprep.subr.bf16.mxu1 %v580_v1  ;;  %v587_v4 = vld [vmem:[%s646_s24] sm:$0xff]   ;;  %v589_v10 = vld [vmem:[%s646_s24 + $0x8] sm:$0xff]   ;;  %v591_v12 = vld [vmem:[%s646_s24 + $0x10] sm:$0xff]  }
   0xf   : > { %v588_v5 = vld [vmem:[%s646_s24 + $0x20] sm:$0xff]   ;;  %539 = vmatprep.mubr.bf16.mxu0 %v587_v4  ;;  %v590_v11 = vld [vmem:[%s646_s24 + $0x28] sm:$0xff]   ;;  %v592_v13 = vld [vmem:[%s646_s24 + $0x30] sm:$0xff]  }
  0x10   : > { %547 = vmatprep.mubr.bf16.mxu1 %v588_v5  ;;  %v593_v14 = vld [vmem:[%s646_s24 + $0x18] sm:$0xff]   ;;  %v488_v16 = vld [vmem:[%s701_s2] ss:$0 sm:$0xff] }
  0x11   : > { %526 = vmatpush3.bf16.msra.mxu0 %v580_v1  ;;  %564 = vmatpush3.bf16.msra.mxu1 %v580_v1  ;;  %v594_v15 = vld [vmem:[%s646_s24 + $0x38] sm:$0xff]  }
  0x12   : > { %527 = vmatprep.subr.bf16.mxu0 %v581_v2  ;;  %557 = vmatprep.subr.bf16.mxu1 %v581_v2 }
  0x15   : > { %528 = vmatpush3.bf16.msra.mxu0 %v581_v2  ;;  %565 = vmatpush3.bf16.msra.mxu1 %v581_v2 }
  0x16   : > { %529 = vmatprep.subr.bf16.mxu0 %v582_v3  ;;  %558 = vmatprep.subr.bf16.mxu1 %v582_v3 }
  0x19   : > { %530 = vmatpush3.bf16.msra.mxu0 %v582_v3  ;;  %566 = vmatpush3.bf16.msra.mxu1 %v582_v3 }
  0x1a   : > { %531 = vmatprep.subr.bf16.mxu0 %v583_v6  ;;  %559 = vmatprep.subr.bf16.mxu1 %v583_v6 }
  0x1d   : > { %532 = vmatpush3.bf16.msra.mxu0 %v583_v6  ;;  %567 = vmatpush3.bf16.msra.mxu1 %v583_v6 }
  0x1e   : > { %533 = vmatprep.subr.bf16.mxu0 %v584_v7  ;;  %560 = vmatprep.subr.bf16.mxu1 %v584_v7 }
  0x21   : > { %534 = vmatpush3.bf16.msra.mxu0 %v584_v7  ;;  %568 = vmatpush3.bf16.msra.mxu1 %v584_v7 }
  0x22   : > { %535 = vmatprep.subr.bf16.mxu0 %v585_v8  ;;  %561 = vmatprep.subr.bf16.mxu1 %v585_v8 }
  0x25   : > { %536 = vmatpush3.bf16.msra.mxu0 %v585_v8  ;;  %569 = vmatpush3.bf16.msra.mxu1 %v585_v8 }
  0x26   : > { %537 = vmatprep.subr.bf16.mxu0 %v586_v9  ;;  %562 = vmatprep.subr.bf16.mxu1 %v586_v9 }
  0x29   : > { %538 = vmatpush3.bf16.msra.mxu0 %v586_v9  ;;  %570 = vmatpush3.bf16.msra.mxu1 %v586_v9 }
  0x2c   : > { %540 = vmatmul.mubr.bf16.vlgmr.msra.gmra.mxu0 %v589_v10  ;;  %548 = vmatmul.mubr.bf16.vlgmr.msra.gmra.mxu1 %v590_v11 }
  0x2d   : > { %543 = vmatprep.mubr.bf16.mxu0 %v591_v12  ;;  %551 = vmatprep.mubr.bf16.mxu1 %v592_v13 }
  0x34   : > { %544 = vmatmul.mubr.bf16.gmra.mxu0 %v593_v14  ;;  %552 = vmatmul.mubr.bf16.gmra.mxu1 %v594_v15 }
  0xec   : > { %v541_v17 = vpop.f32.mrf.mxu0  ;;  %v549_v18 = vpop.f32.mrf.mxu1 }
  0xed   : > { %v353_v19 = vadd.f32 %v541_v17, %v488_v16  ;;  %v385_v20 = vadd.f32 %v549_v18, %v488_v16 }
  0xee   : > { %v344_v21 = vpop.f32.mrf.mxu0  ;;  %v376_v22 = vpop.f32.mrf.mxu1 }
  0xef   : > { %409 = vst [vmem:[%s678_s14 + $0x10] sm:$0xff] %v353_v19  ;;  %417 = vst [vmem:[%s678_s14 + $0x50] sm:$0xff] %v385_v20  ;;  %v345_v23 = vadd.f32 %v488_v16, %v344_v21  ;;  %v377_v24 = vadd.f32 %v488_v16, %v376_v22 }
  0xf0   : > { %v542_v25 = vpop.f32.mrf.mxu0  ;;  %v550_v26 = vpop.f32.mrf.mxu1 }
  0xf1   : > { %407 = vst [vmem:[%s678_s14] sm:$0xff] %v345_v23  ;;  %415 = vst [vmem:[%s678_s14 + $0x40] sm:$0xff] %v377_v24  ;;  %v356_v27 = vadd.f32 %v542_v25, %v488_v16  ;;  %v388_v28 = vadd.f32 %v550_v26, %v488_v16 }
  0xf2   : > { %v347_v29 = vpop.f32.mrf.mxu0  ;;  %v379_v30 = vpop.f32.mrf.mxu1 }
  0xf3   : > { %410 = vst [vmem:[%s678_s14 + $0x18] sm:$0xff] %v356_v27  ;;  %418 = vst [vmem:[%s678_s14 + $0x58] sm:$0xff] %v388_v28  ;;  %v348_v31 = vadd.f32 %v488_v16, %v347_v29  ;;  %v380_v32 = vadd.f32 %v488_v16, %v379_v30 }
  0xf4   : > { %v545_v33 = vpop.f32.mrf.mxu0  ;;  %v553_v34 = vpop.f32.mrf.mxu1 }
  0xf5   : > { %408 = vst [vmem:[%s678_s14 + $0x8] sm:$0xff] %v348_v31  ;;  %416 = vst [vmem:[%s678_s14 + $0x48] sm:$0xff] %v380_v32  ;;  %v369_v35 = vadd.f32 %v545_v33, %v488_v16  ;;  %v401_v36 = vadd.f32 %v553_v34, %v488_v16 }
  0xf6   : > { %v360_v37 = vpop.f32.mrf.mxu0  ;;  %v392_v38 = vpop.f32.mrf.mxu1 }
  0xf7   : > { %413 = vst [vmem:[%s678_s14 + $0x30] sm:$0xff] %v369_v35  ;;  %421 = vst [vmem:[%s678_s14 + $0x70] sm:$0xff] %v401_v36  ;;  %v361_v39 = vadd.f32 %v488_v16, %v360_v37  ;;  %v393_v40 = vadd.f32 %v488_v16, %v392_v38 }
  0xf8   : > { %v546_v41 = vpop.f32.mrf.mxu0  ;;  %v554_v42 = vpop.f32.mrf.mxu1 }
  0xf9   : > { %411 = vst [vmem:[%s678_s14 + $0x20] sm:$0xff] %v361_v39  ;;  %419 = vst [vmem:[%s678_s14 + $0x60] sm:$0xff] %v393_v40  ;;  %v372_v43 = vadd.f32 %v546_v41, %v488_v16  ;;  %v404_v44 = vadd.f32 %v554_v42, %v488_v16 }
  0xfa   : > { %v363_v45 = vpop.f32.mrf.mxu0  ;;  %v395_v46 = vpop.f32.mrf.mxu1 }
  0xfb   : > { %414 = vst [vmem:[%s678_s14 + $0x38] sm:$0xff] %v372_v43  ;;  %422 = vst [vmem:[%s678_s14 + $0x78] sm:$0xff] %v404_v44  ;;  %v364_v47 = vadd.f32 %v488_v16, %v363_v45  ;;  %v396_v48 = vadd.f32 %v488_v16, %v395_v46 }
  0xfd   : > { %412 = vst [vmem:[%s678_s14 + $0x28] sm:$0xff] %v364_v47  ;;  %420 = vst [vmem:[%s678_s14 + $0x68] sm:$0xff] %v396_v48 }
  0xfe PF: > { %s13_s12 = sadd.s32 1, %s601_s12  }
  0xff   : > { %p10_p4 = scmp.ge.s32.totalorder %s13_s12, 4  }
 0x101   :  { %12 = sbr.rel (!%p10_p4) target bundleno = 1 (0x1), region = 62 }

// kernel: model_forward.5
= control target key start
LH: loop header
LB: loop body
LE: loop exit
PB: predicated region body
PF: predicated region fallthrough
CT: control target
= control target key end

     0   :  { %s1835_s24 = smov 0   ;;  %s1837_s25 = smov 0   ;;  %s2067_s0 = inlined_call_operand.vmem [shape: bf16[256,256], index: 0, kind: input, shape index: {}]   ;;  %s2068_s1 = inlined_call_operand.vmem [shape: bf16[256,128], index: 1, kind: input, shape index: {}, may-alias: {1,2}]   ;;  %s2069_s2 = inlined_call_operand.vmem [shape: bf16[256,128], index: 2, kind: input, shape index: {}, may-alias: {1,2}]   ;;  %s2070_s3 = inlined_call_operand.vmem [shape: f32[256,1], index: 3, kind: input, shape index: {}]   ;;  %s2071_s4 = inlined_call_operand.vmem [shape: bf16[128,128], index: 4, kind: input, shape index: {}]   ;;  %s2072_s5 = inlined_call_operand.vmem [shape: bf16[128,128], index: 5, kind: input, shape index: {}]   ;;  %s2073_s6 = inlined_call_operand.vmem [shape: f32[1,128], index: 6, kind: input, shape index: {}]   ;;  %s2074_s7 = inlined_call_operand.vmem [shape: f32[256,128], index: 7, kind: output, shape index: {}]  }
   0x1   :  { %s1839_s26 = smov 0  }
   0x2 LB: > { %s29_s27 = sadd.s32 1, %s1788_s25  ;;  %p1448_p0 = scmp.ge.s32.totalorder %s1792_s26, 1  ;;  %s1792_s26 = sphi %s1839_s26, %s17_s26   ;;  %s1788_s25 = sphi %s1837_s25, %s2076_s25   ;;  %s1784_s24 = sphi %s1835_s24, %s2075_s24  }
   0x3   : > { %p31_p1 = scmp.ge.s32.totalorder %s29_s27, 2  ;;  %p291_p2 = scmp.lt.s32.totalorder %s1792_s26, 3 }
   0x5   : > { %s2078_s27 = smov (%p31_p1, %s29_s27), 0  ;;  %p292_p3 = pnand %p1448_p0, %p291_p2 }
   0x6   : > { %s1449_s30 = sshll.u32 (!%p292_p3), %s1784_s24, 4 }
   0x7   : > { %295 = sbr.rel (%p292_p3) target bundleno = 510 (0x1fe), region = 48  ;;  %p345_p4 = scmp.lt.s32.totalorder (!%p292_p3), %s1449_s30, 31 }
   0xc   : > { %v1706_v0 = vld [vmem:[%s2068_s1 + $0x78] sm:$0xff]   ;;  %v1708_v2 = vld [vmem:[%s2068_s1 + $0x70] sm:$0xff]   ;;  %v1794_v4 = vmov 0   ;;  %v1710_v5 = vld [vmem:[%s2068_s1 + $0x68] sm:$0xff]   ;;  %s2080_s30 = smov (!%p345_p4, %s1449_s30), 31 }
   0xd   : > { %v1707_v1 = vld [vmem:[%s2068_s1 + $0x38] sm:$0xff]   ;;  %1518 = vmatprep.subr.bf16.mxu0 %v1706_v0  ;;  %v1709_v3 = vld [vmem:[%s2068_s1 + $0x30] sm:$0xff]   ;;  %1704 = vset.pattern.permute.xlu0 %v1794_v4  ;;  %v1711_v6 = vld [vmem:[%s2068_s1 + $0x28] sm:$0xff]   ;;  %s1880_s22 = sshll.u32 %s2080_s30, 3  ;;  %s1453_s13 = sshll.u32 %s2080_s30, 2 }
   0xe   : > { %1519 = vmatpush3.bf16.msra.mxu0 %v1707_v1  ;;  %1705 = vset.pattern.permute.xlu1 %v1794_v4  ;;  %v1712_v7 = vld [vmem:[%s2068_s1 + $0x60] sm:$0xff]   ;;  %v1714_v9 = vld [vmem:[%s2068_s1 + $0x58] sm:$0xff]   ;;  %s1889_s8 = scalar_lea.vmem %s2067_s0, %s1880_s22  ;;  %v1716_v11 = vld [vmem:[%s2068_s1 + $0x50] sm:$0xff]   ;;  %s1911_s21 = scalar_lea.vmem %s2070_s3, %s1880_s22 }
   0xf   : > { %1520 = vmatprep.subr.bf16.mxu0 %v1708_v2  ;;  %v1713_v8 = vld [vmem:[%s2068_s1 + $0x20] sm:$0xff]   ;;  %v1715_v10 = vld [vmem:[%s2068_s1 + $0x18] sm:$0xff]   ;;  %v1717_v13 = vld [vmem:[%s2068_s1 + $0x10] sm:$0xff]   ;;  %s1944_s18 = scalar_lea.vmem %s2069_s2, %s1453_s13  ;;  %s2023_s12 = scalar_lea.vmem %s2074_s7, %s1880_s22 }
  0x10   : > { %v1724_v12 = vld [vmem:[%s1889_s8 + $0x4] ss:$8 sps:$4 sm:$0xff]   ;;  %v790_v19 = vld [vmem:[%s1911_s21 + $0x10] sm:$0xff]  ;;  %v791_v21 = vld [vmem:[%s1911_s21 + $0x18] sm:$0xff] }
  0x11   : > { %672 = vmatprep.mubr.bf16.mxu0 %v1724_v12  ;;  %v1718_v14 = vld [vmem:[%s2068_s1 + $0x48] sm:$0xff]   ;;  %v1720_v16 = vld [vmem:[%s2068_s1 + $0x40] sm:$0xff]   ;;  %816 = vperm.xlu1 %1705, %v790_v19   ;;  %v1725_v23 = vld [vmem:[%s1889_s8 + $0x14] ss:$8 sps:$4 sm:$0xff]  }
  0x12   : > { %1521 = vmatpush3.bf16.msra.mxu0 %v1709_v3  ;;  %v1719_v15 = vld [vmem:[%s2068_s1 + $0x8] sm:$0xff]   ;;  %v788_v17 = vld [vmem:[%s1911_s21] sm:$0xff]  ;;  %v1746_v26 = vld [vmem:[%s2072_s5 + $0x38] sm:$0xff]  }
  0x13   : > { %1522 = vmatprep.subr.bf16.mxu0 %v1710_v5  ;;  %v1721_v18 = vld [vmem:[%s2068_s1] sm:$0xff]   ;;  %806 = vperm.xlu0 %1704, %v788_v17   ;;  %v789_v20 = vld [vmem:[%s1911_s21 + $0x8] sm:$0xff]  ;;  %v1747_v27 = vld [vmem:[%s2072_s5 + $0x30] sm:$0xff]  }
  0x14   : > { %v1722_v22 = vld [vmem:[%s1889_s8] ss:$8 sps:$4 sm:$0xff]   ;;  %1614 = vmatprep.subr.bf16.mxu1 %v1746_v26  ;;  %v794_v28 = vld [vmem:[%s1911_s21 + $0x30] sm:$0xff]  ;;  %v795_v30 = vld [vmem:[%s1911_s21 + $0x38] sm:$0xff] }
  0x15   : > { %v792_v24 = vld [vmem:[%s1911_s21 + $0x20] sm:$0xff]  ;;  %v793_v25 = vld [vmem:[%s1911_s21 + $0x28] sm:$0xff]  ;;  %821 = vperm.xlu1 %1705, %v791_v21   ;;  %v1727_v29 = vld [vmem:[%s1889_s8 + $0x10] ss:$8 sps:$4 sm:$0xff]   ;;  %1615 = vmatpush3.bf16.msra.mxu1 %v1746_v26 }
  0x16   : > { %1523 = vmatpush3.bf16.msra.mxu0 %v1711_v6  ;;  %v1728_v31 = vld [vmem:[%s1889_s8 + $0x24] ss:$8 sps:$4 sm:$0xff]   ;;  %1616 = vmatprep.subr.bf16.mxu1 %v1747_v27  ;;  %v798_v37 = vld [vmem:[%s1911_s21 + $0x50] sm:$0xff]  ;;  %v799_v38 = vld [vmem:[%s1911_s21 + $0x58] sm:$0xff] }
  0x17   : > { %1524 = vmatprep.subr.bf16.mxu0 %v1712_v7  ;;  %811 = vperm.xlu0 %1704, %v789_v20   ;;  %v1748_v32 = vld [vmem:[%s2072_s5 + $0x28] sm:$0xff]   ;;  %v796_v33 = vld [vmem:[%s1911_s21 + $0x40] sm:$0xff]  ;;  %v1750_v39 = vld [vmem:[%s2072_s5 + $0x18] sm:$0xff]  }
  0x18   : > { %v797_v34 = vld [vmem:[%s1911_s21 + $0x48] sm:$0xff]  ;;  %v1754_v35 = vld [vmem:[%s1944_s18] sm:$0xff]   ;;  %v1731_v41 = vld [vmem:[%s1889_s8 + $0x34] ss:$8 sps:$4 sm:$0xff]  }
  0x19   : > { %831 = vperm.xlu1 %1705, %v793_v25   ;;  %1617 = vmatpush3.bf16.msra.mxu1 %v1747_v27  ;;  %v1749_v36 = vld [vmem:[%s2072_s5 + $0x20] sm:$0xff]   ;;  %v801_v43 = vld [vmem:[%s1911_s21 + $0x68] sm:$0xff]  ;;  %v1751_v44 = vld [vmem:[%s2072_s5 + $0x10] sm:$0xff]  }
  0x1a   : > { %1525 = vmatpush3.bf16.msra.mxu0 %v1713_v8  ;;  %1618 = vmatprep.subr.bf16.mxu1 %v1748_v32  ;;  %v1730_v40 = vld [vmem:[%s1889_s8 + $0x20] ss:$8 sps:$4 sm:$0xff]   ;;  %v802_v45 = vld [vmem:[%s1911_s21 + $0x70] sm:$0xff]  ;;  %v803_v46 = vld [vmem:[%s1911_s21 + $0x78] sm:$0xff] }
  0x1b   : > { %1526 = vmatprep.subr.bf16.mxu0 %v1714_v9  ;;  %826 = vperm.xlu0 %1704, %v792_v24   ;;  %v800_v42 = vld [vmem:[%s1911_s21 + $0x60] sm:$0xff]  ;;  %v1752_v47 = vld [vmem:[%s2072_s5 + $0x8] sm:$0xff]   ;;  %v1733_v48 = vld [vmem:[%s1889_s8 + $0x30] ss:$8 sps:$4 sm:$0xff]  }
  0x1c   : > { %1630 = vmatprep.mubr.bf16.mxu1 %v1754_v35  ;;  %v1734_v49 = vld [vmem:[%s1889_s8 + $0x44] ss:$8 sps:$4 sm:$0xff]   ;;  %v1756_v51 = vld [vmem:[%s2071_s4 + $0x38] sm:$0xff]   ;;  %v1736_v52 = vld [vmem:[%s1889_s8 + $0x40] ss:$8 sps:$4 sm:$0xff]  }
  0x1d   : > { %841 = vperm.xlu1 %1705, %v795_v30   ;;  %1619 = vmatpush3.bf16.msra.mxu1 %v1748_v32  ;;  %v1753_v50 = vld [vmem:[%s2072_s5] sm:$0xff]   ;;  %v1737_v53 = vld [vmem:[%s1889_s8 + $0x54] ss:$8 sps:$4 sm:$0xff]   ;;  %v1755_v54 = vld [vmem:[%s1944_s18 + $0x8] sm:$0xff]  }
  0x1e   : > { %1527 = vmatpush3.bf16.msra.mxu0 %v1715_v10  ;;  %1620 = vmatprep.subr.bf16.mxu1 %v1749_v36  ;;  %v1739_v55 = vld [vmem:[%s1889_s8 + $0x50] ss:$8 sps:$4 sm:$0xff]   ;;  %v1740_v56 = vld [vmem:[%s1889_s8 + $0x64] ss:$8 sps:$4 sm:$0xff]   ;;  %v1742_v57 = vld [vmem:[%s1889_s8 + $0x60] ss:$8 sps:$4 sm:$0xff]  }
  0x1f   : > { %1528 = vmatprep.subr.bf16.mxu0 %v1716_v11  ;;  %836 = vperm.xlu0 %1704, %v794_v28   ;;  %v1743_v58 = vld [vmem:[%s1889_s8 + $0x74] ss:$8 sps:$4 sm:$0xff]   ;;  %v1745_v59 = vld [vmem:[%s1889_s8 + $0x70] ss:$8 sps:$4 sm:$0xff]   ;;  %v1760_v63 = vld [vmem:[%s2071_s4 + $0x28] sm:$0xff]  }
  0x20   : > { %v1757_v60 = vld [vmem:[%s2071_s4 + $0x30] sm:$0xff]   ;;  %v1759_v62 = vld [vmem:[%s1944_s18 + $0x18] sm:$0xff]   ;;  %v1761_v0 = vld [vmem:[%s2071_s4 + $0x20] sm:$0xff]  }
  0x21   : > { %851 = vperm.xlu1 %1705, %v797_v34   ;;  %1621 = vmatpush3.bf16.msra.mxu1 %v1749_v36  ;;  %v1758_v61 = vld [vmem:[%s1944_s18 + $0x10] sm:$0xff]   ;;  %v1762_v1 = vld [vmem:[%s1944_s18 + $0x20] sm:$0xff]   ;;  %v1763_v2 = vld [vmem:[%s1944_s18 + $0x28] sm:$0xff]  }
  0x22   : > { %1529 = vmatpush3.bf16.msra.mxu0 %v1717_v13  ;;  %1622 = vmatprep.subr.bf16.mxu1 %v1750_v39  ;;  %v1764_v3 = vld [vmem:[%s2071_s4 + $0x18] sm:$0xff]   ;;  %v1765_v4 = vld [vmem:[%s2071_s4 + $0x10] sm:$0xff]   ;;  %v1768_v7 = vld [vmem:[%s2071_s4 + $0x8] sm:$0xff]  }
  0x23   : > { %1530 = vmatprep.subr.bf16.mxu0 %v1718_v14  ;;  %846 = vperm.xlu0 %1704, %v796_v33   ;;  %v1766_v5 = vld [vmem:[%s1944_s18 + $0x30] sm:$0xff]   ;;  %v1767_v6 = vld [vmem:[%s1944_s18 + $0x38] sm:$0xff]   ;;  %v1769_v8 = vld [vmem:[%s2071_s4] sm:$0xff]  }
  0x25   : > { %861 = vperm.xlu1 %1705, %v799_v38   ;;  %1623 = vmatpush3.bf16.msra.mxu1 %v1750_v39 }
  0x26   : > { %1531 = vmatpush3.bf16.msra.mxu0 %v1719_v15  ;;  %1624 = vmatprep.subr.bf16.mxu1 %v1751_v44 }
  0x27   : > { %1532 = vmatprep.subr.bf16.mxu0 %v1720_v16  ;;  %856 = vperm.xlu0 %1704, %v798_v37  }
  0x29   : > { %871 = vperm.xlu1 %1705, %v801_v43   ;;  %1625 = vmatpush3.bf16.msra.mxu1 %v1751_v44 }
  0x2a   : > { %1533 = vmatpush3.bf16.msra.mxu0 %v1721_v18  ;;  %1626 = vmatprep.subr.bf16.mxu1 %v1752_v47 }
  0x2b   : > { %866 = vperm.xlu0 %1704, %v800_v42  }
  0x2d   : > { %673 = vmatmul.mubr.bf16.vlgmr.msra.gmra.mxu0 %v1722_v22  ;;  %881 = vperm.xlu1 %1705, %v803_v46  }
  0x2e   : > { %680 = vmatprep.mubr.bf16.mxu0 %v1725_v23  ;;  %1627 = vmatpush3.bf16.msra.mxu1 %v1752_v47 }
  0x2f   : > { %876 = vperm.xlu0 %1704, %v802_v45   ;;  %1628 = vmatprep.subr.bf16.mxu1 %v1753_v50 }
  0x32   : > { %1629 = vmatpush3.bf16.msra.mxu1 %v1753_v50 }
  0x33   : > { %1646 = vmatprep.subr.bf16.mxu1 %v1756_v51 }
  0x35   : > { %681 = vmatmul.mubr.bf16.gmra.mxu0 %v1727_v29  ;;  %1631 = vmatmul.mubr.bf16.vlgmr.msra.gmra.mxu1 %v1755_v54 }
  0x36   : > { %688 = vmatprep.mubr.bf16.mxu0 %v1728_v31  ;;  %1647 = vmatpush3.bf16.msra.mxu1 %v1756_v51 }
  0x37   : > { %1648 = vmatprep.subr.bf16.mxu1 %v1757_v60  ;;  %1634 = vmatprep.mubr.bf16.mxu1 %v1758_v61 }
  0x3a   : > { %1649 = vmatpush3.bf16.msra.mxu1 %v1757_v60 }
  0x3b   : > { %1650 = vmatprep.subr.bf16.mxu1 %v1760_v63 }
  0x3d   : > { %689 = vmatmul.mubr.bf16.gmra.mxu0 %v1730_v40  ;;  %1635 = vmatmul.mubr.bf16.gmra.mxu1 %v1759_v62 }
  0x3e   : > { %696 = vmatprep.mubr.bf16.mxu0 %v1731_v41  ;;  %1651 = vmatpush3.bf16.msra.mxu1 %v1760_v63 }
  0x3f   : > { %1652 = vmatprep.subr.bf16.mxu1 %v1761_v0  ;;  %1638 = vmatprep.mubr.bf16.mxu1 %v1762_v1 }
  0x42   : > { %1653 = vmatpush3.bf16.msra.mxu1 %v1761_v0 }
  0x43   : > { %1654 = vmatprep.subr.bf16.mxu1 %v1764_v3 }
  0x45   : > { %697 = vmatmul.mubr.bf16.gmra.mxu0 %v1733_v48  ;;  %1639 = vmatmul.mubr.bf16.gmra.mxu1 %v1763_v2 }
  0x46   : > { %704 = vmatprep.mubr.bf16.mxu0 %v1734_v49  ;;  %1655 = vmatpush3.bf16.msra.mxu1 %v1764_v3 }
  0x47   : > { %1656 = vmatprep.subr.bf16.mxu1 %v1765_v4  ;;  %1642 = vmatprep.mubr.bf16.mxu1 %v1766_v5 }
  0x4a   : > { %1657 = vmatpush3.bf16.msra.mxu1 %v1765_v4 }
  0x4b   : > { %1658 = vmatprep.subr.bf16.mxu1 %v1768_v7 }
  0x4d   : > { %705 = vmatmul.mubr.bf16.gmra.mxu0 %v1736_v52  ;;  %1643 = vmatmul.mubr.bf16.gmra.mxu1 %v1767_v6 }
  0x4e   : > { %712 = vmatprep.mubr.bf16.mxu0 %v1737_v53  ;;  %1659 = vmatpush3.bf16.msra.mxu1 %v1768_v7 }
  0x4f   : > { %1660 = vmatprep.subr.bf16.mxu1 %v1769_v8 }
  0x52   : > { %1661 = vmatpush3.bf16.msra.mxu1 %v1769_v8 }
  0x55   : > { %713 = vmatmul.mubr.bf16.gmra.mxu0 %v1739_v55 }
  0x56   : > { %720 = vmatprep.mubr.bf16.mxu0 %v1740_v56 }
  0x5d   : > { %721 = vmatmul.mubr.bf16.gmra.mxu0 %v1742_v57 }
  0x5e   : > { %728 = vmatprep.mubr.bf16.mxu0 %v1743_v58 }
  0x65   : > { %729 = vmatmul.mubr.bf16.gmra.mxu0 %v1745_v59 }
  0x8c   : > { %v817_v23 = vpop.permute.xlu1 %816 }
  0x8e   : > { %v807_v11 = vpop.permute.xlu0 %806 }
  0x90   : > { %v822_v29 = vpop.permute.xlu1 %821 }
  0x92   : > { %v812_v17 = vpop.permute.xlu0 %811 }
  0x94   : > { %v832_v39 = vpop.permute.xlu1 %831 }
  0x96   : > { %v827_v38 = vpop.permute.xlu0 %826 }
  0x98   : > { %v842_v50 = vpop.permute.xlu1 %841 }
  0x9a   : > { %v837_v49 = vpop.permute.xlu0 %836 }
  0x9c   : > { %v852_v61 = vpop.permute.xlu1 %851 }
  0x9e   : > { %v847_v60 = vpop.permute.xlu0 %846 }
  0xa0   : > { %v862_v8 = vpop.permute.xlu1 %861 }
  0xa2   : > { %v857_v7 = vpop.permute.xlu0 %856 }
  0xed   : > { %v1534_v9 = vpop.f32.mrf.mxu0 }
  0xef   : > { %v1535_v10 = vpop.f32.mrf.mxu0 }
  0xf0   : > { %v1536_v12 = vadd.f32 %v1535_v10, %v1534_v9 }
  0xf1   : > { %v1537_v13 = vpop.f32.mrf.mxu0 }
  0xf2   : > { %v884_v20 = vmul.f32 %v1536_v12, %v807_v11 }
  0xf3   : > { %v1538_v14 = vpop.f32.mrf.mxu0 }
  0xf4   : > { %v1539_v15 = vadd.f32 %v1538_v14, %v1537_v13 }
  0xf5   : > { %v1540_v16 = vpop.f32.mrf.mxu0 }
  0xf6   : > { %v885_v21 = vmul.f32 %v1539_v15, %v812_v17 }
  0xf7   : > { %v1541_v18 = vpop.f32.mrf.mxu0 }
  0xf8   : > { %v1542_v19 = vadd.f32 %v1541_v18, %v1540_v16  ;;  %v900_v24 = vpack.c.bf16 %v885_v21, %v884_v20  ;;  %v867_v18 = vpop.permute.xlu0 %866 }
  0xf9   : > { %v1543_v22 = vpop.f32.mrf.mxu0 }
  0xfa   : > { %1662 = vmatprep.mubr.bf16.mxu1 %v900_v24  ;;  %v886_v30 = vmul.f32 %v1542_v19, %v817_v23  ;;  %v872_v19 = vpop.permute.xlu1 %871 }
  0xfb   : > { %v1544_v25 = vpop.f32.mrf.mxu0 }
  0xfc   : > { %v1545_v26 = vadd.f32 %v1544_v25, %v1543_v22 }
  0xfd   : > { %v1546_v27 = vpop.f32.mrf.mxu0 }
  0xfe   : > { %v887_v32 = vmul.f32 %v1545_v26, %v822_v29  ;;  %v882_v29 = vpop.permute.xlu1 %881 }
  0xff   : > { %v1547_v28 = vpop.f32.mrf.mxu0 }
 0x100   : > { %v1548_v31 = vadd.f32 %v1547_v28, %v1546_v27  ;;  %v901_v34 = vpack.c.bf16 %v887_v32, %v886_v30  ;;  %v877_v28 = vpop.permute.xlu0 %876 }
 0x101   : > { %v1549_v33 = vpop.f32.mrf.mxu0 }
 0x102   : > { %1663 = vmatmul.mubr.bf16.vlgmr.msra.gmra.mxu1 %v901_v34  ;;  %v888_v41 = vmul.f32 %v1548_v31, %v827_v38 }
 0x103   : > { %v1550_v35 = vpop.f32.mrf.mxu0 }
 0x104   : > { %v1551_v36 = vadd.f32 %v1550_v35, %v1549_v33  ;;  %v1632_v33 = vpop.f32.mrf.mxu1 }
 0x105   : > { %v1552_v37 = vpop.f32.mrf.mxu0 }
 0x106   : > { %v889_v42 = vmul.f32 %v1551_v36, %v832_v39  ;;  %v1086_v34 = vpop.f32.mrf.mxu1 }
 0x107   : > { %v1553_v40 = vpop.f32.mrf.mxu0 }
 0x108   : > { %v1554_v43 = vadd.f32 %v1553_v40, %v1552_v37  ;;  %v902_v45 = vpack.c.bf16 %v889_v42, %v888_v41  ;;  %v1633_v35 = vpop.f32.mrf.mxu1 }
 0x109   : > { %v1555_v44 = vpop.f32.mrf.mxu0 }
 0x10a   : > { %1666 = vmatprep.mubr.bf16.mxu1 %v902_v45  ;;  %v890_v52 = vmul.f32 %v1554_v43, %v837_v49  ;;  %v1089_v36 = vpop.f32.mrf.mxu1 }
 0x10b   : > { %v1556_v46 = vpop.f32.mrf.mxu0 }
 0x10c   : > { %v1557_v47 = vadd.f32 %v1556_v46, %v1555_v44  ;;  %v1636_v37 = vpop.f32.mrf.mxu1 }
 0x10d   : > { %v1558_v48 = vpop.f32.mrf.mxu0 }
 0x10e   : > { %v891_v54 = vmul.f32 %v1557_v47, %v842_v50  ;;  %v1102_v38 = vpop.f32.mrf.mxu1  ;;  %v2017_v50 = vld [vmem:[%s2073_s6] ss:$0 sm:$0xff] }
 0x10f   : > { %v1559_v51 = vpop.f32.mrf.mxu0 }
 0x110   : > { %v1560_v53 = vadd.f32 %v1559_v51, %v1558_v48  ;;  %v903_v56 = vpack.c.bf16 %v891_v54, %v890_v52  ;;  %v1637_v39 = vpop.f32.mrf.mxu1 }
 0x111   : > { %v1561_v55 = vpop.f32.mrf.mxu0 }
 0x112   : > { %1667 = vmatmul.mubr.bf16.gmra.mxu1 %v903_v56  ;;  %v892_v0 = vmul.f32 %v1560_v53, %v847_v60  ;;  %v1105_v40 = vpop.f32.mrf.mxu1 }
 0x113   : > { %v1562_v57 = vpop.f32.mrf.mxu0 }
 0x114   : > { %v1563_v58 = vadd.f32 %v1562_v57, %v1561_v55  ;;  %v1640_v41 = vpop.f32.mrf.mxu1 }
 0x115   : > { %v1564_v59 = vpop.f32.mrf.mxu0 }
 0x116   : > { %v893_v1 = vmul.f32 %v1563_v58, %v852_v61  ;;  %v1118_v42 = vpop.f32.mrf.mxu1 }
 0x117   : > { %v1565_v62 = vpop.f32.mrf.mxu0 }
 0x118   : > { %v1566_v63 = vadd.f32 %v1565_v62, %v1564_v59  ;;  %v904_v3 = vpack.c.bf16 %v893_v1, %v892_v0  ;;  %v1641_v43 = vpop.f32.mrf.mxu1 }
 0x119   : > { %v1567_v2 = vpop.f32.mrf.mxu0 }
 0x11a   : > { %1670 = vmatprep.mubr.bf16.mxu1 %v904_v3  ;;  %v894_v11 = vmul.f32 %v1566_v63, %v857_v7  ;;  %v1121_v44 = vpop.f32.mrf.mxu1 }
 0x11b   : > { %v1568_v4 = vpop.f32.mrf.mxu0 }
 0x11c   : > { %v1569_v5 = vadd.f32 %v1568_v4, %v1567_v2  ;;  %v1644_v45 = vpop.f32.mrf.mxu1 }
 0x11d   : > { %v1570_v6 = vpop.f32.mrf.mxu0 }
 0x11e   : > { %v895_v12 = vmul.f32 %v1569_v5, %v862_v8  ;;  %v1134_v46 = vpop.f32.mrf.mxu1 }
 0x11f   : > { %v1571_v9 = vpop.f32.mrf.mxu0 }
 0x120   : > { %v1572_v10 = vadd.f32 %v1571_v9, %v1570_v6  ;;  %v905_v14 = vpack.c.bf16 %v895_v12, %v894_v11  ;;  %v1645_v47 = vpop.f32.mrf.mxu1 }
 0x121   : > { %v1573_v13 = vpop.f32.mrf.mxu0 }
 0x122   : > { %1671 = vmatmul.mubr.bf16.gmra.mxu1 %v905_v14  ;;  %v896_v22 = vmul.f32 %v1572_v10, %v867_v18  ;;  %v2012_v48 = vpop.f32.mrf.mxu1 }
 0x123   : > { %v1574_v15 = vpop.f32.mrf.mxu0 }
 0x124   : > { %v1575_v16 = vadd.f32 %v1574_v15, %v1573_v13 }
 0x125   : > { %v1576_v17 = vpop.f32.mrf.mxu0 }
 0x126   : > { %v897_v23 = vmul.f32 %v1575_v16, %v872_v19 }
 0x127   : > { %v1577_v20 = vpop.f32.mrf.mxu0 }
 0x128   : > { %v1578_v21 = vadd.f32 %v1577_v20, %v1576_v17  ;;  %v906_v25 = vpack.c.bf16 %v897_v23, %v896_v22 }
 0x129   : > { %v1579_v24 = vpop.f32.mrf.mxu0 }
 0x12a   : > { %1674 = vmatprep.mubr.bf16.mxu1 %v906_v25  ;;  %v898_v30 = vmul.f32 %v1578_v21, %v877_v28 }
 0x12b   : > { %v1580_v26 = vpop.f32.mrf.mxu0 }
 0x12c   : > { %v1581_v27 = vadd.f32 %v1580_v26, %v1579_v24 }
 0x12e   : > { %v899_v31 = vmul.f32 %v1581_v27, %v882_v29 }
 0x130   : > { %v907_v32 = vpack.c.bf16 %v899_v31, %v898_v30 }
 0x132   : > { %1675 = vmatmul.mubr.bf16.gmra.mxu1 %v907_v32 }
 0x1c2   : > { %v1664_v49 = vpop.f32.mrf.mxu1 }
 0x1c3   : > { %v1240_v51 = vadd.f32 %v1664_v49, %v1632_v33 }
 0x1c4   : > { %v1231_v52 = vpop.f32.mrf.mxu1 }
 0x1c5   : > { %v1303_v53 = vadd.f32 %v2017_v50, %v1240_v51  ;;  %v1232_v54 = vadd.f32 %v1231_v52, %v1086_v34 }
 0x1c6   : > { %v1665_v55 = vpop.f32.mrf.mxu1 }
 0x1c7   : > { %1319 = vst [vmem:[%s2023_s12 + $0x10] sm:$0xff] %v1303_v53  ;;  %v1301_v56 = vadd.f32 %v2017_v50, %v1232_v54  ;;  %v1243_v57 = vadd.f32 %v1665_v55, %v1633_v35 }
 0x1c8   : > { %v1234_v58 = vpop.f32.mrf.mxu1 }
 0x1c9   : > { %1317 = vst [vmem:[%s2023_s12] sm:$0xff] %v1301_v56  ;;  %v1304_v59 = vadd.f32 %v2017_v50, %v1243_v57  ;;  %v1235_v60 = vadd.f32 %v1234_v58, %v1089_v36 }
 0x1cb   : > { %1320 = vst [vmem:[%s2023_s12 + $0x18] sm:$0xff] %v1304_v59  ;;  %v1302_v61 = vadd.f32 %v2017_v50, %v1235_v60 }
 0x1cd   : > { %1318 = vst [vmem:[%s2023_s12 + $0x8] sm:$0xff] %v1302_v61 }
 0x1d2   : > { %v1668_v62 = vpop.f32.mrf.mxu1 }
 0x1d3   : > { %v1256_v63 = vadd.f32 %v1668_v62, %v1636_v37 }
 0x1d4   : > { %v1247_v0 = vpop.f32.mrf.mxu1 }
 0x1d5   : > { %v1307_v1 = vadd.f32 %v2017_v50, %v1256_v63  ;;  %v1248_v2 = vadd.f32 %v1247_v0, %v1102_v38 }
 0x1d6   : > { %v1669_v3 = vpop.f32.mrf.mxu1 }
 0x1d7   : > { %1323 = vst [vmem:[%s2023_s12 + $0x30] sm:$0xff] %v1307_v1  ;;  %v1305_v4 = vadd.f32 %v2017_v50, %v1248_v2  ;;  %v1259_v5 = vadd.f32 %v1669_v3, %v1637_v39 }
 0x1d8   : > { %v1250_v6 = vpop.f32.mrf.mxu1 }
 0x1d9   : > { %1321 = vst [vmem:[%s2023_s12 + $0x20] sm:$0xff] %v1305_v4  ;;  %v1308_v7 = vadd.f32 %v2017_v50, %v1259_v5  ;;  %v1251_v8 = vadd.f32 %v1250_v6, %v1105_v40 }
 0x1db   : > { %1324 = vst [vmem:[%s2023_s12 + $0x38] sm:$0xff] %v1308_v7  ;;  %v1306_v9 = vadd.f32 %v2017_v50, %v1251_v8 }
 0x1dd   : > { %1322 = vst [vmem:[%s2023_s12 + $0x28] sm:$0xff] %v1306_v9 }
 0x1e2   : > { %v1672_v10 = vpop.f32.mrf.mxu1 }
 0x1e3   : > { %v1272_v11 = vadd.f32 %v1672_v10, %v1640_v41 }
 0x1e4   : > { %v1263_v12 = vpop.f32.mrf.mxu1 }
 0x1e5   : > { %v1311_v13 = vadd.f32 %v2017_v50, %v1272_v11  ;;  %v1264_v14 = vadd.f32 %v1263_v12, %v1118_v42 }
 0x1e6   : > { %v1673_v15 = vpop.f32.mrf.mxu1 }
 0x1e7   : > { %1327 = vst [vmem:[%s2023_s12 + $0x50] sm:$0xff] %v1311_v13  ;;  %v1309_v16 = vadd.f32 %v2017_v50, %v1264_v14  ;;  %v1275_v17 = vadd.f32 %v1673_v15, %v1641_v43 }
 0x1e8   : > { %v1266_v18 = vpop.f32.mrf.mxu1 }
 0x1e9   : > { %1325 = vst [vmem:[%s2023_s12 + $0x40] sm:$0xff] %v1309_v16  ;;  %v1312_v19 = vadd.f32 %v2017_v50, %v1275_v17  ;;  %v1267_v20 = vadd.f32 %v1266_v18, %v1121_v44 }
 0x1eb   : > { %1328 = vst [vmem:[%s2023_s12 + $0x58] sm:$0xff] %v1312_v19  ;;  %v1310_v21 = vadd.f32 %v2017_v50, %v1267_v20 }
 0x1ed   : > { %1326 = vst [vmem:[%s2023_s12 + $0x48] sm:$0xff] %v1310_v21 }
 0x1f2   : > { %v1676_v22 = vpop.f32.mrf.mxu1 }
 0x1f3   : > { %v1288_v23 = vadd.f32 %v1676_v22, %v1644_v45 }
 0x1f4   : > { %v1279_v24 = vpop.f32.mrf.mxu1 }
 0x1f5   : > { %v1315_v25 = vadd.f32 %v2017_v50, %v1288_v23  ;;  %v1280_v26 = vadd.f32 %v1279_v24, %v1134_v46 }
 0x1f6   : > { %v1677_v27 = vpop.f32.mrf.mxu1 }
 0x1f7   : > { %1331 = vst [vmem:[%s2023_s12 + $0x70] sm:$0xff] %v1315_v25  ;;  %v1313_v28 = vadd.f32 %v2017_v50, %v1280_v26  ;;  %v1291_v29 = vadd.f32 %v1677_v27, %v1645_v47 }
 0x1f8   : > { %v1282_v30 = vpop.f32.mrf.mxu1 }
 0x1f9   : > { %1329 = vst [vmem:[%s2023_s12 + $0x60] sm:$0xff] %v1313_v28  ;;  %v1316_v31 = vadd.f32 %v2017_v50, %v1291_v29  ;;  %v1283_v32 = vadd.f32 %v1282_v30, %v2012_v48 }
 0x1fb   : > { %1332 = vst [vmem:[%s2023_s12 + $0x78] sm:$0xff] %v1316_v31  ;;  %v1314_v33 = vadd.f32 %v2017_v50, %v1283_v32 }
 0x1fd   : > { %1330 = vst [vmem:[%s2023_s12 + $0x68] sm:$0xff] %v1314_v33 }
 0x1fe PF: > { %s17_s26 = sadd.s32 1, %s1792_s26   ;;  %s2075_s24 = smov %s1788_s25 }
 0x1ff   : > { %p14_p5 = scmp.ge.s32.totalorder %s17_s26, 4   ;;  %s2076_s25 = smov %s2078_s27 }
 0x201   :  { %16 = sbr.rel (!%p14_p5) target bundleno = 2 (0x2), region = 95 }

</bundles_post_ra>
